<compile_context>
chip_gen: v7x
topology: tpu7x:2x2x1
jax: 0.10.0
libtpu: 0.0.40
codegen_flags: <defaults>
</compile_context>

<pallas_src>
import functools

import jax
import jax.numpy as jnp
from jax.experimental import pallas as pl
from jax.experimental.pallas import tpu as pltpu

# Network dimensions (match the PyTorch module: 8 -> 64 -> 32 -> 16 -> 4).
_IN, _H1, _H2, _H3 = 8, 64, 32, 16

# Packed weight slab layout: (128, 64) bf16. Each layer's (in, out) block starts on a
# 16-row boundary (bf16 packs 2 rows per sublane, so 16 rows = one native tile).
_W1_R0 = 0      # w1: rows   0:8,    cols 0:64
_W2_R0 = 16     # w2: rows  16:80,   cols 0:32
_W3_R0 = 80     # w3: rows  80:112,  cols 0:16
_W4_R0 = 112    # w4: rows 112:128,  cols 0:out_dim
_WPACK_ROWS, _WPACK_COLS = 128, 64


def _round_up(n, m):
    return ((n + m - 1) // m) * m


def _mlp_kernel(x_ref, w_ref, b_ref, out_ref, *, out_dim):
    """Fused 4-layer MLP: bf16 MXU operands, f32 accumulation / f32 epilogue."""
    x = x_ref[...].astype(jnp.bfloat16)

    w1 = w_ref[_W1_R0:_W1_R0 + _IN, :_H1]
    w2 = w_ref[_W2_R0:_W2_R0 + _H1, :_H2]
    w3 = w_ref[_W3_R0:_W3_R0 + _H2, :_H3]
    w4 = w_ref[_W4_R0:_W4_R0 + _H3, :out_dim]

    b1 = b_ref[0:1, :_H1]
    b2 = b_ref[1:2, :_H2]
    b3 = b_ref[2:3, :_H3]
    b4 = b_ref[3:4, :out_dim]

    h = jnp.dot(x, w1, preferred_element_type=jnp.float32) + b1
    h = jnp.maximum(h, 0.0).astype(jnp.bfloat16)

    h = jnp.dot(h, w2, preferred_element_type=jnp.float32) + b2
    h = jnp.maximum(h, 0.0).astype(jnp.bfloat16)

    h = jnp.dot(h, w3, preferred_element_type=jnp.float32) + b3
    h = jnp.maximum(h, 0.0).astype(jnp.bfloat16)

    q = jnp.dot(h, w4, preferred_element_type=jnp.float32) + b4
    out_ref[...] = q.astype(out_ref.dtype)


def pack_params(params):
    """Pack the 8 small weight/bias arrays into two HBM buffers (2 input DMAs, not 8)."""
    out_dim = params["w4"].shape[1]
    w = jnp.zeros((_WPACK_ROWS, _WPACK_COLS), jnp.bfloat16)
    w = w.at[_W1_R0:_W1_R0 + _IN, :_H1].set(params["w1"].astype(jnp.bfloat16))
    w = w.at[_W2_R0:_W2_R0 + _H1, :_H2].set(params["w2"].astype(jnp.bfloat16))
    w = w.at[_W3_R0:_W3_R0 + _H2, :_H3].set(params["w3"].astype(jnp.bfloat16))
    w = w.at[_W4_R0:_W4_R0 + _H3, :out_dim].set(params["w4"].astype(jnp.bfloat16))

    b = jnp.zeros((4, _WPACK_COLS), jnp.float32)
    b = b.at[0, :_H1].set(params["b1"][0])
    b = b.at[1, :_H2].set(params["b2"][0])
    b = b.at[2, :_H3].set(params["b3"][0])
    b = b.at[3, :out_dim].set(params["b4"][0])
    return w, b


def custom_q_network(x, packed_w, packed_b, out_dim, *, tile_b=512):
    """Forward pass of CustomQNetwork as one fused, batch-tiled Pallas kernel."""
    batch, in_dim = x.shape
    assert in_dim == _IN, f"expected input dim {_IN}, got {in_dim}"

    # Batch tile: big enough to amortize the ~0.35us/grid-step overhead, yet tiny vs.
    # VMEM even with 128-lane padding of the activations (v7x has only 64 MiB).
    tile_b = min(tile_b, max(8, _round_up(batch, 8)))
    padded_batch = _round_up(batch, tile_b)
    if padded_batch != batch:
        x = jnp.pad(x, ((0, padded_batch - batch), (0, 0)))

    grid = (padded_batch // tile_b,)

    flops = 2 * padded_batch * (_IN * _H1 + _H1 * _H2 + _H2 * _H3 + _H3 * out_dim)
    bytes_accessed = (padded_batch * (_IN + out_dim) * 4
                      + packed_w.size * packed_w.dtype.itemsize
                      + packed_b.size * packed_b.dtype.itemsize)

    out = pl.pallas_call(
        functools.partial(_mlp_kernel, out_dim=out_dim),
        out_shape=jax.ShapeDtypeStruct((padded_batch, out_dim), jnp.float32),
        grid=grid,
        in_specs=[
            # activations: one batch tile per grid step (DMA pipelined behind compute)
            pl.BlockSpec((tile_b, _IN), lambda i: (i, 0)),
            # parameters: constant index_map -> fetched once, VMEM-resident
            pl.BlockSpec((_WPACK_ROWS, _WPACK_COLS), lambda i: (0, 0)),
            pl.BlockSpec((4, _WPACK_COLS), lambda i: (0, 0)),
        ],
        out_specs=pl.BlockSpec((tile_b, out_dim), lambda i: (i, 0)),
        compiler_params=pltpu.CompilerParams(
            dimension_semantics=("parallel",)),  # v7x: shard batch tiles across 2 TCs
        cost_estimate=pl.CostEstimate(
            flops=flops, transcendentals=0, bytes_accessed=bytes_accessed),
    )(x, packed_w, packed_b)

    return out[:batch]


def init_params(key, input_dim, output_dim):
    """PyTorch nn.Linear-style init; weights stored as (in_features, out_features)."""
    dims = [input_dim, _H1, _H2, _H3, output_dim]
    params = {}
    for i in range(4):
        fan_in, fan_out = dims[i], dims[i + 1]
        key, kw, kb = jax.random.split(key, 3)
        bound = 1.0 / (fan_in ** 0.5)
        params[f"w{i+1}"] = jax.random.uniform(
            kw, (fan_in, fan_out), jnp.float32, minval=-bound, maxval=bound)
        params[f"b{i+1}"] = jax.random.uniform(
            kb, (1, fan_out), jnp.float32, minval=-bound, maxval=bound)
    return params


def _reference_forward(x, params):
    """Pure-JAX reference with the same mixed precision as the kernel
    (bf16 matmul operands, f32 accumulation, f32 bias-add/ReLU)."""
    h = x
    for i in range(1, 4):
        h = jnp.dot(h.astype(jnp.bfloat16), params[f"w{i}"].astype(jnp.bfloat16),
                    preferred_element_type=jnp.float32) + params[f"b{i}"]
        h = jnp.maximum(h, 0.0)
    return jnp.dot(h.astype(jnp.bfloat16), params["w4"].astype(jnp.bfloat16),
                   preferred_element_type=jnp.float32) + params["b4"]


if __name__ == "__main__":
    key = jax.random.PRNGKey(0)

    input_dim = 8    # observation_space.shape[0]
    output_dim = 4   # action_space.n

    k_params, k_x1, k_x2 = jax.random.split(key, 3)
    params = init_params(k_params, input_dim, output_dim)
    packed_w, packed_b = pack_params(params)

    # Small-batch inference path (batch=2 -> single grid step).
    x_small = jax.random.normal(k_x1, (2, input_dim), dtype=jnp.float32)
    q_small = jax.block_until_ready(
        custom_q_network(x_small, packed_w, packed_b, output_dim))
    assert q_small.shape == (2, output_dim)
    assert jnp.allclose(q_small, _reference_forward(x_small, params),
                        atol=1e-3, rtol=1e-3), "small-batch mismatch vs reference"

    # Larger batch to exercise the tiled grid + padding path (3 grid steps).
    x_big = jax.random.normal(k_x2, (600, input_dim), dtype=jnp.float32)
    q_big = jax.block_until_ready(
        custom_q_network(x_big, packed_w, packed_b, output_dim, tile_b=256))
    assert q_big.shape == (600, output_dim)
    assert jnp.allclose(q_big, _reference_forward(x_big, params),
                        atol=1e-3, rtol=1e-3), "batched mismatch vs reference"

    print("KERNEL_OK")
</pallas_src>

<mosaic_0001>
module attributes {stable_mosaic.version = 11 : i64} {
  func.func @_mlp_kernel(%arg0: i32, %arg1: memref<8x8xf32, #tpu.memory_space<vmem>>, %arg2: memref<128x64xbf16, #tpu.memory_space<vmem>>, %arg3: memref<4x64xf32, #tpu.memory_space<vmem>>, %arg4: memref<8x4xf32, #tpu.memory_space<vmem>>) attributes {dimension_semantics = [#tpu.dimension_semantics<parallel>], iteration_bounds = array<i64: 1>, scalar_prefetch = 0 : i64, scratch_operands = 0 : i64, tpu.core_type = #tpu.core_type<tc>, window_params = [{transform_indices = @transform_0, window_bounds = array<i64: 8, 8>}, {pipeline_mode = #tpu.pipeline_mode<synchronous>, transform_indices = @transform_1, window_bounds = array<i64: 128, 64>}, {pipeline_mode = #tpu.pipeline_mode<synchronous>, transform_indices = @transform_2, window_bounds = array<i64: 4, 64>}, {transform_indices = @transform_3, window_bounds = array<i64: 8, 4>}]} {
    %c0 = arith.constant 0 : index
    %c0_0 = arith.constant 0 : index
    %0 = vector.load %arg1[%c0, %c0_0] : memref<8x8xf32, #tpu.memory_space<vmem>>, vector<8x8xf32>
    %1 = arith.truncf %0 : vector<8x8xf32> to vector<8x8xbf16>
    %c0_1 = arith.constant 0 : index
    %c0_2 = arith.constant 0 : index
    %2 = vector.load %arg2[%c0_1, %c0_2] : memref<128x64xbf16, #tpu.memory_space<vmem>>, vector<8x64xbf16>
    %c16 = arith.constant 16 : index
    %c0_3 = arith.constant 0 : index
    %3 = vector.load %arg2[%c16, %c0_3] : memref<128x64xbf16, #tpu.memory_space<vmem>>, vector<64x32xbf16>
    %c80 = arith.constant 80 : index
    %c0_4 = arith.constant 0 : index
    %4 = vector.load %arg2[%c80, %c0_4] : memref<128x64xbf16, #tpu.memory_space<vmem>>, vector<32x16xbf16>
    %c112 = arith.constant 112 : index
    %c0_5 = arith.constant 0 : index
    %5 = vector.load %arg2[%c112, %c0_5] : memref<128x64xbf16, #tpu.memory_space<vmem>>, vector<16x4xbf16>
    %c0_6 = arith.constant 0 : index
    %c0_7 = arith.constant 0 : index
    %6 = vector.load %arg3[%c0_6, %c0_7] : memref<4x64xf32, #tpu.memory_space<vmem>>, vector<1x64xf32>
    %c1 = arith.constant 1 : index
    %c0_8 = arith.constant 0 : index
    %7 = vector.load %arg3[%c1, %c0_8] : memref<4x64xf32, #tpu.memory_space<vmem>>, vector<1x32xf32>
    %c2 = arith.constant 2 : index
    %c0_9 = arith.constant 0 : index
    %8 = vector.load %arg3[%c2, %c0_9] : memref<4x64xf32, #tpu.memory_space<vmem>>, vector<1x16xf32>
    %c3 = arith.constant 3 : index
    %c0_10 = arith.constant 0 : index
    %9 = vector.load %arg3[%c3, %c0_10] : memref<4x64xf32, #tpu.memory_space<vmem>>, vector<1x4xf32>
    %cst = arith.constant dense<0.000000e+00> : vector<8x64xf32>
    %10 = tpu.matmul %1, %2, %cst {dimension_numbers = #tpu.dot_dimension_numbers<[1], [0], [0], [1], [0, 0, 1, 1], [], []>} : vector<8x8xbf16>, vector<8x64xbf16>, vector<8x64xf32> -> vector<8x64xf32>
    %11 = vector.broadcast %6 : vector<1x64xf32> to vector<8x64xf32>
    %12 = arith.addf %10, %11 : vector<8x64xf32>
    %cst_11 = arith.constant 0.000000e+00 : f32
    %13 = vector.broadcast %cst_11 : f32 to vector<8x64xf32>
    %14 = arith.maximumf %12, %13 : vector<8x64xf32>
    %15 = arith.truncf %14 : vector<8x64xf32> to vector<8x64xbf16>
    %cst_12 = arith.constant dense<0.000000e+00> : vector<8x32xf32>
    %16 = tpu.matmul %15, %3, %cst_12 {dimension_numbers = #tpu.dot_dimension_numbers<[1], [0], [0], [1], [0, 0, 1, 1], [], []>} : vector<8x64xbf16>, vector<64x32xbf16>, vector<8x32xf32> -> vector<8x32xf32>
    %17 = vector.broadcast %7 : vector<1x32xf32> to vector<8x32xf32>
    %18 = arith.addf %16, %17 : vector<8x32xf32>
    %cst_13 = arith.constant 0.000000e+00 : f32
    %19 = vector.broadcast %cst_13 : f32 to vector<8x32xf32>
    %20 = arith.maximumf %18, %19 : vector<8x32xf32>
    %21 = arith.truncf %20 : vector<8x32xf32> to vector<8x32xbf16>
    %cst_14 = arith.constant dense<0.000000e+00> : vector<8x16xf32>
    %22 = tpu.matmul %21, %4, %cst_14 {dimension_numbers = #tpu.dot_dimension_numbers<[1], [0], [0], [1], [0, 0, 1, 1], [], []>} : vector<8x32xbf16>, vector<32x16xbf16>, vector<8x16xf32> -> vector<8x16xf32>
    %23 = vector.broadcast %8 : vector<1x16xf32> to vector<8x16xf32>
    %24 = arith.addf %22, %23 : vector<8x16xf32>
    %cst_15 = arith.constant 0.000000e+00 : f32
    %25 = vector.broadcast %cst_15 : f32 to vector<8x16xf32>
    %26 = arith.maximumf %24, %25 : vector<8x16xf32>
    %27 = arith.truncf %26 : vector<8x16xf32> to vector<8x16xbf16>
    %cst_16 = arith.constant dense<0.000000e+00> : vector<8x4xf32>
    %28 = tpu.matmul %27, %5, %cst_16 {dimension_numbers = #tpu.dot_dimension_numbers<[1], [0], [0], [1], [0, 0, 1, 1], [], []>} : vector<8x16xbf16>, vector<16x4xbf16>, vector<8x4xf32> -> vector<8x4xf32>
    %29 = vector.broadcast %9 : vector<1x4xf32> to vector<8x4xf32>
    %30 = arith.addf %28, %29 : vector<8x4xf32>
    %c0_17 = arith.constant 0 : index
    %c0_18 = arith.constant 0 : index
    %31 = vector.load %arg4[%c0_17, %c0_18] : memref<8x4xf32, #tpu.memory_space<vmem>>, vector<8x4xf32>
    tpu.vector_store %arg4[%c0_17, %c0_18], %30 {strides = array<i32>} : memref<8x4xf32, #tpu.memory_space<vmem>>, vector<8x4xf32>,
    return
  }
  func.func @transform_0(%arg0: i32) -> (i32, i32) {
    %c0_i32 = arith.constant 0 : i32
    %c0_i32_0 = arith.constant 0 : i32
    return %arg0, %c0_i32 : i32, i32
  }
  func.func @transform_1(%arg0: i32) -> (i32, i32) {
    %c0_i32 = arith.constant 0 : i32
    %c0_i32_0 = arith.constant 0 : i32
    %c0_i32_1 = arith.constant 0 : i32
    return %c0_i32, %c0_i32_0 : i32, i32
  }
  func.func @transform_2(%arg0: i32) -> (i32, i32) {
    %c0_i32 = arith.constant 0 : i32
    %c0_i32_0 = arith.constant 0 : i32
    %c0_i32_1 = arith.constant 0 : i32
    return %c0_i32, %c0_i32_0 : i32, i32
  }
  func.func @transform_3(%arg0: i32) -> (i32, i32) {
    %c0_i32 = arith.constant 0 : i32
    %c0_i32_0 = arith.constant 0 : i32
    return %arg0, %c0_i32 : i32, i32
  }
}

</mosaic_0001>

<bundles_post_ra>
// kernel: tpu_custom_call.1
= control target key start
LH: loop header
LB: loop body
LE: loop exit
PB: predicated region body
PF: predicated region fallthrough
CT: control target
= control target key end

     0   :  { %vm44_vm0 = vcmask 1043456   ;;  %v354_v0 = vmov 0.0   ;;  %vm355_vm1 = vmmov 0   ;;  %vm40_vm2 = vcmask 64512   ;;  %s422_s1 = inlined_call_operand.vmem [shape: bf16[128,64], index: 1, kind: input, shape index: {}]   ;;  %s423_s0 = inlined_call_operand.vmem [shape: f32[8,8], index: 0, kind: input, shape index: {}]   ;;  %s424_s2 = inlined_call_operand.vmem [shape: f32[4,64], index: 2, kind: input, shape index: {}]   ;;  %s425_s3 = inlined_call_operand.vmem [shape: f32[8,4], index: 3, kind: output, shape index: {}]  }
   0x1   :  { %313 = vmatprep.subr.bf16.mxu0 %v354_v0  ;;  %v17_v1 = vld [vmem:[%s422_s1] sm:$0xf]  ;;  %315 = vmatprep.mubr.msk.bf16.mxu0 %vm355_vm1, %v354_v0  ;;  %v347_v5 = vld [vmem:[%s422_s1 + $0x8] sm:$0xff]   ;;  %v348_v6 = vld [vmem:[%s422_s1 + $0x10] sm:$0xff]   ;;  %vm118_vm3 = vcmask 523264   ;;  %vm180_vm4 = vcmask 261120  }
   0x2   :  { %v15_v2 = vld [vmem:[%s423_s0] sm:$0xff]  ;;  %v46_v3 = vsel %vm44_vm0, %v17_v1, 0  ;;  %319 = vmatprep.subr.bf16.mxu1 %v354_v0  ;;  %327 = vmatprep.mubr.msk.bf16.mxu1 %vm355_vm1, %v354_v0  ;;  %v349_v7 = vld [vmem:[%s422_s1 + $0x18] sm:$0xff]   ;;  %v351_v9 = vld [vmem:[%s422_s1 + $0x28] sm:$0xff]   ;;  %vm236_vm5 = vcmask 130048   ;;  %vm280_vm6 = vcmask 31744  }
   0x3   :  { %v16_v4 = vpack.c.bf16 %v15_v2, %v15_v2  ;;  %314 = vmatpush3.bf16.msra.mxu0 %v46_v3  ;;  %320 = vmatpush3.bf16.msra.mxu1 %v347_v5  ;;  %v350_v8 = vld [vmem:[%s422_s1 + $0x20] sm:$0xff]   ;;  %v352_v18 = vld [vmem:[%s422_s1 + $0x30] sm:$0xff]   ;;  %v353_v26 = vld [vmem:[%s422_s1 + $0x38] sm:$0xff]  }
   0x4   :  { %331 = vmatprep.subr.bf16.mxu0 %v354_v0  ;;  %321 = vmatprep.subr.bf16.mxu1 %v354_v0  ;;  %v286_v10 = vld [vmem:[%s424_s2] ss:$0 sm:$0xff]  ;;  %v288_v19 = vld [vmem:[%s424_s2 + $0x1] ss:$0 sm:$0xff]  ;;  %v294_v28 = vld [vmem:[%s424_s2 + $0x2] ss:$0 sm:$0xff] }
   0x5   :  { %v298_v36 = vld [vmem:[%s424_s2 + $0x3] ss:$0 sm:$0xff] }
   0x6   :  { %316 = vmatmul.mubr.msk.bf16.vlgmr.msra.gmra.mrb[0].mxu0 %vm40_vm2, %v16_v4 }
   0x7   :  { %335 = vmatprep.mubr.msk.bf16.mxu0 %vm355_vm1, %v354_v0  ;;  %322 = vmatpush3.bf16.msra.mxu1 %v348_v6 }
   0x8   :  { %323 = vmatprep.subr.bf16.mxu1 %v354_v0  ;;  %332 = vmatpush3.bf16.msra.mxu0 %v351_v9 }
   0x9   :  { %333 = vmatprep.subr.bf16.mxu0 %v354_v0 }
   0xb   :  { %324 = vmatpush3.bf16.msra.mxu1 %v349_v7 }
   0xc   :  { %325 = vmatprep.subr.bf16.mxu1 %v354_v0  ;;  %334 = vmatpush3.bf16.msra.mxu0 %v352_v18 }
   0xd   :  { %339 = vmatprep.subr.bf16.mxu0 %v354_v0 }
   0xf   :  { %326 = vmatpush3.bf16.msra.mxu1 %v350_v8 }
  0xd9   :  { %v82_v11 = vpop.f32.mrb[0].mxu0 }
  0xda   :  { %v83_v12 = vadd.f32 %v286_v10, %v82_v11  ;;  %v317_v13 = vpop.f32.mrb[1].mxu0 }
  0xdb   :  { %v85_v14 = vpop.f32.mrb[2].mxu0 }
  0xdc   :  { %v88_v15 = vmax.f32 %v83_v12, 0.0  ;;  %v318_v16 = vpop.f32.mrb[3].mxu0 }
  0xde   :  { %v89_v17 = vpack.c.bf16 %v88_v15, %v88_v15 }
  0xe0   :  { %328 = vmatmul.mubr.msk.bf16.vlgmr.msra.gmra.mrb[0].mxu1 %vm118_vm3, %v89_v17 }
 0x1b3   :  { %v156_v20 = vpop.f32.mrb[0].mxu1 }
 0x1b4   :  { %v157_v21 = vadd.f32 %v288_v19, %v156_v20  ;;  %v329_v22 = vpop.f32.mrb[1].mxu1 }
 0x1b5   :  { %v159_v23 = vpop.f32.mrb[2].mxu1 }
 0x1b6   :  { %v162_v24 = vmax.f32 %v157_v21, 0.0  ;;  %v330_v25 = vpop.f32.mrb[3].mxu1 }
 0x1b8   :  { %v163_v27 = vpack.c.bf16 %v162_v24, %v162_v24 }
 0x1ba   :  { %336 = vmatmul.mubr.msk.bf16.vlgmr.msra.gmra.mrb[4].mxu0 %vm180_vm4, %v163_v27 }
 0x1bb   :  { %340 = vmatpush3.bf16.msra.mxu0 %v353_v26  ;;  %341 = vmatprep.mubr.msk.bf16.mxu0 %vm355_vm1, %v354_v0 }
 0x28d   :  { %v218_v29 = vpop.f32.mrb[4].mxu0 }
 0x28e   :  { %v219_v30 = vadd.f32 %v294_v28, %v218_v29  ;;  %v337_v31 = vpop.f32.mrb[5].mxu0 }
 0x28f   :  { %v221_v32 = vpop.f32.mrb[6].mxu0 }
 0x290   :  { %v224_v33 = vmax.f32 %v219_v30, 0.0  ;;  %v338_v34 = vpop.f32.mrb[7].mxu0 }
 0x292   :  { %v225_v35 = vpack.c.bf16 %v224_v33, %v224_v33 }
 0x294   :  { %342 = vmatmul.mubr.msk.bf16.vlgmr.msra.gmra.mrb[8].mxu0 %vm236_vm5, %v225_v35 }
 0x367   :  { %v274_v37 = vpop.f32.mrb[8].mxu0 }
 0x368   :  { %v275_v38 = vadd.f32 %v298_v36, %v274_v37  ;;  %v343_v39 = vpop.f32.mrb[9].mxu0 }
 0x369   :  { %v277_v40 = vpop.f32.mrb[10].mxu0 }
 0x36a   :  { %281 = vst.msk [vmem:[%s425_s3] sm:$0xff] %vm280_vm6, %v275_v38  ;;  %v344_v41 = vpop.f32.mrb[11].mxu0 }

</bundles_post_ra>
